<compile_context>
chip_gen: v6e
topology: v6e:2x2x1
jax: 0.10.0
libtpu: 0.0.40
codegen_flags: <defaults>
</compile_context>

<pallas_src>
import functools

import jax
import jax.numpy as jnp
from jax.experimental import pallas as pl
from jax.experimental.pallas import tpu as pltpu

EPS = 1e-5  # PyTorch BatchNorm2d default


def _conv_bn_relu_kernel(x_ref, w_ref, g_ref, b_ref, o_ref, im2col_ref,
                         sum_ref, sq_ref, *, k_h, h_out, m_total):
    p = pl.program_id(0)    # pass: 0 = conv + batch stats, 1 = conv + BN + ReLU
    nb = pl.program_id(1)   # batch block

    b_blk, _, cw = x_ref.shape
    m_rows, _ = o_ref.shape
    h_tile = m_rows // b_blk

    @pl.when(jnp.logical_and(p == 0, nb == 0))
    def _init():
        sum_ref[...] = jnp.zeros_like(sum_ref)
        sq_ref[...] = jnp.zeros_like(sq_ref)

    # Fused im2col, staged in VMEM: copy each shifted (h_tile, CW) window of each
    # batch element into the (B_blk*H_tile, K_h*CW) slab. Destination sublane
    # offsets are multiples of the (16-row) bf16 tile; only ref slicing is used.
    for b in range(b_blk):
        for kh in range(k_h):
            im2col_ref[pl.ds(b * h_tile, h_tile), pl.ds(kh * cw, cw)] = (
                x_ref[b, kh:kh + h_tile, :])

    # ONE MXU dot: (B_blk*H_tile, K_h*CW) @ (K_h*CW, C_pad), f32 accumulation.
    y = jnp.dot(im2col_ref[...], w_ref[...], preferred_element_type=jnp.float32)

    @pl.when(p == 0)
    def _stats():
        yv = y
        if h_tile != h_out:  # mask rows whose window runs into the zero row-pad
            rr = jax.lax.broadcasted_iota(jnp.int32, (m_rows, 1), 0) % h_tile
            yv = jnp.where(rr < h_out, y, 0.0)
        sum_ref[...] += jnp.sum(yv, axis=0, keepdims=True)
        sq_ref[...] += jnp.sum(yv * y, axis=0, keepdims=True)
        # No o_ref write here: the output block index is constant in pass 0, so
        # nothing is flushed to HBM until pass 1 overwrites this block.

    @pl.when(jnp.logical_and(p == 1, nb == 0))
    def _finalize_stats():
        # Fold mean/var/gamma/beta into per-channel scale/shift ONCE and cache
        # them in the stats scratch for the remaining pass-1 steps.
        inv_m = 1.0 / m_total
        mean = sum_ref[...] * inv_m
        var = jnp.maximum(sq_ref[...] * inv_m - mean * mean, 0.0)
        scale = g_ref[...] * jax.lax.rsqrt(var + EPS)      # EUP rsqrt
        sum_ref[...] = scale
        sq_ref[...] = b_ref[...] - mean * scale

    @pl.when(p == 1)
    def _normalize():
        o_ref[...] = jnp.maximum(y * sum_ref[...] + sq_ref[...],
                                 0.0).astype(o_ref.dtype)


def agnostic_conv_block(x, weight, bias, gamma, beta):
    """x: (N, C_in, H, W) NCHW; weight: (C_out, C_in, K_h, K_w) PyTorch OIHW.

    The module uses kernel width == n_points == input width, so W_out == 1.
    `bias` is accepted for API fidelity but exactly cancelled by train-mode BN.
    """
    del bias  # cancelled by the batch-mean subtraction (training-mode BN)
    n, c_in, h, w = x.shape
    c_out, c_in_w, k_h, k_w = weight.shape
    assert c_in == c_in_w and w == k_w, "expects input width == n_points (W_out == 1)"
    h_out = h - k_h + 1
    cw = c_in * w
    k_dim = k_h * cw
    c_pad = ((c_out + 127) // 128) * 128          # lane-dense output channels
    h_tile = ((h_out + 15) // 16) * 16            # bf16 sublane-tile aligned rows/elem
    h_pad = h_tile + k_h - 1                      # input rows the kernel windows over

    # Batch blocking: make M = b_blk*h_tile big enough for the MXU, inside a
    # conservative VMEM budget (valid on v7x's 64 MiB as well as v5e/v6e).
    target_m = 256
    b_blk = max(1, min(-(-target_m // h_tile), 16, n))

    def _tile_bytes(b):
        xb = 2 * b * h_pad * cw * 2           # x tile, bf16, double-buffered
        ob = 2 * b * h_tile * c_pad * 2       # out tile, bf16, double-buffered
        wb = 2 * k_dim * c_pad * 2            # weights, bf16, double-buffered
        sb = b * h_tile * k_dim * 2           # im2col scratch, bf16
        tb = 2 * b * h_tile * c_pad * 4       # live f32 temporaries (headroom)
        return xb + ob + wb + sb + tb

    while b_blk > 1 and _tile_bytes(b_blk) > (20 << 20):
        b_blk -= 1
    n_blocks = -(-n // b_blk)
    n_pad = n_blocks * b_blk
    m_rows = b_blk * h_tile

    # NCHW -> (N, H, C_in*W): one transpose, no K_h-fold im2col duplication in
    # HBM. Zero-padded batch elements / rows contribute exactly zero to the
    # batch statistics (divisor is the true N*h_out) and are sliced off below.
    x_r = jnp.transpose(x, (0, 2, 1, 3)).reshape(n, h, cw)
    x_r = jnp.pad(x_r, ((0, n_pad - n), (0, h_pad - h), (0, 0))).astype(jnp.bfloat16)

    # OIHW -> (K_h*C_in*K_w, C_pad): kh-major to match the im2col slab ordering;
    # zero-padded lanes; bf16 MXU feed.
    w_k = jnp.transpose(weight, (2, 1, 3, 0)).reshape(k_dim, c_out)
    w_k = jnp.pad(w_k, ((0, 0), (0, c_pad - c_out))).astype(jnp.bfloat16)

    g_p = jnp.pad(gamma.astype(jnp.float32)[None, :], ((0, 0), (0, c_pad - c_out)))
    b_p = jnp.pad(beta.astype(jnp.float32)[None, :], ((0, 0), (0, c_pad - c_out)))

    kernel = functools.partial(_conv_bn_relu_kernel, k_h=k_h, h_out=h_out,
                               m_total=float(n * h_out))

    out = pl.pallas_call(
        kernel,
        out_shape=jax.ShapeDtypeStruct((n_pad * h_tile, c_pad), jnp.bfloat16),
        grid=(2, n_blocks),  # (pass, batch block) -- must stay sequential
        in_specs=[
            pl.BlockSpec((b_blk, h_pad, cw), lambda p, nb: (nb, 0, 0)),   # x
            pl.BlockSpec((k_dim, c_pad), lambda p, nb: (0, 0)),           # weights
            pl.BlockSpec((1, c_pad), lambda p, nb: (0, 0)),               # gamma
            pl.BlockSpec((1, c_pad), lambda p, nb: (0, 0)),               # beta
        ],
        # Constant block index during pass 0 -> the output block stays VMEM
        # resident (no HBM writeback) until pass 1 overwrites and flushes it.
        out_specs=pl.BlockSpec((m_rows, c_pad), lambda p, nb: (p * nb, 0)),
        scratch_shapes=[
            pltpu.VMEM((m_rows, k_dim), jnp.bfloat16),   # staged im2col slab
            pltpu.VMEM((1, c_pad), jnp.float32),         # running sum   -> scale
            pltpu.VMEM((1, c_pad), jnp.float32),         # running sumsq -> shift
        ],
        compiler_params=pltpu.CompilerParams(
            dimension_semantics=("arbitrary", "arbitrary"),
            vmem_limit_bytes=32 * 1024 * 1024),
    )(x_r, w_k, g_p, b_p)

    # (N_pad*H_tile, C_pad) -> slice real rows/channels -> NCHW f32 output.
    out = out.reshape(n_pad, h_tile, c_pad)[:n, :h_out, :c_out]
    out = jnp.transpose(out, (0, 2, 1)).astype(jnp.float32)
    return out.reshape(n, c_out, h_out, 1)


def _reference(x, weight, bias, gamma, beta):
    # Pure-JAX f32 reference of the PyTorch forward (training-mode BatchNorm).
    y = jax.lax.conv_general_dilated(
        x, weight, window_strides=(1, 1), padding="VALID",
        dimension_numbers=("NCHW", "OIHW", "NCHW"))
    y = y + bias.reshape(1, -1, 1, 1)
    mean = jnp.mean(y, axis=(0, 2, 3), keepdims=True)
    var = jnp.mean(jnp.square(y - mean), axis=(0, 2, 3), keepdims=True)
    y = (y - mean) * jax.lax.rsqrt(var + EPS)
    y = y * gamma.reshape(1, -1, 1, 1) + beta.reshape(1, -1, 1, 1)
    return jnp.maximum(y, 0.0)


if __name__ == "__main__":
    # Module hyperparameters (small, consistent with the forward semantics).
    n_inp, n_points, past_t, hidden_dim = 4, 16, 3, 32
    N, H, W = 2, 16, n_points  # width == n_points so the conv collapses the points dim

    key = jax.random.PRNGKey(0)
    kx, kw, kb, kg, kbe = jax.random.split(key, 5)

    x = jax.random.normal(kx, (N, n_inp, H, W), dtype=jnp.float32)
    fan_in = n_inp * past_t * n_points
    weight = jax.random.normal(kw, (hidden_dim, n_inp, past_t, n_points),
                               dtype=jnp.float32) * (1.0 / jnp.sqrt(fan_in))
    bias = jax.random.normal(kb, (hidden_dim,), dtype=jnp.float32) * 0.1
    gamma = 1.0 + 0.1 * jax.random.normal(kg, (hidden_dim,), dtype=jnp.float32)
    beta = 0.1 * jax.random.normal(kbe, (hidden_dim,), dtype=jnp.float32)

    out = jax.block_until_ready(agnostic_conv_block(x, weight, bias, gamma, beta))
    ref = jax.block_until_ready(_reference(x, weight, bias, gamma, beta))

    assert out.shape == (N, hidden_dim, H - past_t + 1, W - n_points + 1)
    # bf16 MXU operands and bf16 kernel output vs f32 reference.
    assert jnp.allclose(out, ref, atol=4e-2, rtol=4e-2)
    print("KERNEL_OK")
</pallas_src>

<mosaic_0001>
module attributes {stable_mosaic.version = 11 : i64} {
  func.func @_conv_bn_relu_kernel(%arg0: i32, %arg1: i32, %arg2: memref<2x18x64xbf16, #tpu.memory_space<vmem>>, %arg3: memref<192x128xbf16, #tpu.memory_space<vmem>>, %arg4: memref<1x128xf32, #tpu.memory_space<vmem>>, %arg5: memref<1x128xf32, #tpu.memory_space<vmem>>, %arg6: memref<32x128xbf16, #tpu.memory_space<vmem>>, %arg7: memref<32x192xbf16, #tpu.memory_space<vmem>>, %arg8: memref<1x128xf32, #tpu.memory_space<vmem>>, %arg9: memref<1x128xf32, #tpu.memory_space<vmem>>) attributes {dimension_semantics = [#tpu.dimension_semantics<arbitrary>, #tpu.dimension_semantics<arbitrary>], iteration_bounds = array<i64: 2, 1>, scalar_prefetch = 0 : i64, scratch_operands = 3 : i64, tpu.core_type = #tpu.core_type<tc>, window_params = [{transform_indices = @transform_0, window_bounds = array<i64: 2, 18, 64>}, {pipeline_mode = #tpu.pipeline_mode<synchronous>, transform_indices = @transform_1, window_bounds = array<i64: 192, 128>}, {pipeline_mode = #tpu.pipeline_mode<synchronous>, transform_indices = @transform_2, window_bounds = array<i64: 1, 128>}, {pipeline_mode = #tpu.pipeline_mode<synchronous>, transform_indices = @transform_3, window_bounds = array<i64: 1, 128>}, {transform_indices = @transform_4, window_bounds = array<i64: 32, 128>}]} {
    %c0_i32 = arith.constant 0 : i32
    %0 = arith.cmpi eq, %arg0, %c0_i32 : i32
    %c0_i32_0 = arith.constant 0 : i32
    %1 = arith.cmpi eq, %arg1, %c0_i32_0 : i32
    %2 = arith.andi %0, %1 : i1
    %3 = arith.extui %2 : i1 to i32
    %c0_i32_1 = arith.constant 0 : i32
    %4 = arith.cmpi ne, %3, %c0_i32_1 : i32
    scf.if %4 {
      %cst_36 = arith.constant 0.000000e+00 : f32
      %37 = vector.broadcast %cst_36 : f32 to vector<1x128xf32>
      %c0_37 = arith.constant 0 : index
      %c0_38 = arith.constant 0 : index
      %38 = vector.load %arg8[%c0_37, %c0_38] : memref<1x128xf32, #tpu.memory_space<vmem>>, vector<1x128xf32>
      tpu.vector_store %arg8[%c0_37, %c0_38], %37 {strides = array<i32>} : memref<1x128xf32, #tpu.memory_space<vmem>>, vector<1x128xf32>,
      %cst_39 = arith.constant 0.000000e+00 : f32
      %39 = vector.broadcast %cst_39 : f32 to vector<1x128xf32>
      %c0_40 = arith.constant 0 : index
      %c0_41 = arith.constant 0 : index
      %40 = vector.load %arg9[%c0_40, %c0_41] : memref<1x128xf32, #tpu.memory_space<vmem>>, vector<1x128xf32>
      tpu.vector_store %arg9[%c0_40, %c0_41], %39 {strides = array<i32>} : memref<1x128xf32, #tpu.memory_space<vmem>>, vector<1x128xf32>,
    } else {
    }
    %c0 = arith.constant 0 : index
    %c0_2 = arith.constant 0 : index
    %c0_3 = arith.constant 0 : index
    %5 = vector.load %arg2[%c0, %c0_2, %c0_3] : memref<2x18x64xbf16, #tpu.memory_space<vmem>>, vector<1x16x64xbf16>
    %6 = vector.shape_cast %5 : vector<1x16x64xbf16> to vector<16x64xbf16>
    %c0_4 = arith.constant 0 : index
    %c0_5 = arith.constant 0 : index
    %7 = vector.load %arg7[%c0_4, %c0_5] : memref<32x192xbf16, #tpu.memory_space<vmem>>, vector<16x64xbf16>
    tpu.vector_store %arg7[%c0_4, %c0_5], %6 {strides = array<i32>} : memref<32x192xbf16, #tpu.memory_space<vmem>>, vector<16x64xbf16>,
    %c0_6 = arith.constant 0 : index
    %c1 = arith.constant 1 : index
    %c0_7 = arith.constant 0 : index
    %8 = vector.load %arg2[%c0_6, %c1, %c0_7] : memref<2x18x64xbf16, #tpu.memory_space<vmem>>, vector<1x16x64xbf16>
    %9 = vector.shape_cast %8 : vector<1x16x64xbf16> to vector<16x64xbf16>
    %c0_8 = arith.constant 0 : index
    %c64 = arith.constant 64 : index
    %10 = vector.load %arg7[%c0_8, %c64] : memref<32x192xbf16, #tpu.memory_space<vmem>>, vector<16x64xbf16>
    tpu.vector_store %arg7[%c0_8, %c64], %9 {strides = array<i32>} : memref<32x192xbf16, #tpu.memory_space<vmem>>, vector<16x64xbf16>,
    %c0_9 = arith.constant 0 : index
    %c2 = arith.constant 2 : index
    %c0_10 = arith.constant 0 : index
    %11 = vector.load %arg2[%c0_9, %c2, %c0_10] : memref<2x18x64xbf16, #tpu.memory_space<vmem>>, vector<1x16x64xbf16>
    %12 = vector.shape_cast %11 : vector<1x16x64xbf16> to vector<16x64xbf16>
    %c0_11 = arith.constant 0 : index
    %c128 = arith.constant 128 : index
    %13 = vector.load %arg7[%c0_11, %c128] : memref<32x192xbf16, #tpu.memory_space<vmem>>, vector<16x64xbf16>
    tpu.vector_store %arg7[%c0_11, %c128], %12 {strides = array<i32>} : memref<32x192xbf16, #tpu.memory_space<vmem>>, vector<16x64xbf16>,
    %c1_12 = arith.constant 1 : index
    %c0_13 = arith.constant 0 : index
    %c0_14 = arith.constant 0 : index
    %14 = vector.load %arg2[%c1_12, %c0_13, %c0_14] : memref<2x18x64xbf16, #tpu.memory_space<vmem>>, vector<1x16x64xbf16>
    %15 = vector.shape_cast %14 : vector<1x16x64xbf16> to vector<16x64xbf16>
    %c16 = arith.constant 16 : index
    %c0_15 = arith.constant 0 : index
    %16 = vector.load %arg7[%c16, %c0_15] : memref<32x192xbf16, #tpu.memory_space<vmem>>, vector<16x64xbf16>
    tpu.vector_store %arg7[%c16, %c0_15], %15 {strides = array<i32>} : memref<32x192xbf16, #tpu.memory_space<vmem>>, vector<16x64xbf16>,
    %c1_16 = arith.constant 1 : index
    %c1_17 = arith.constant 1 : index
    %c0_18 = arith.constant 0 : index
    %17 = vector.load %arg2[%c1_16, %c1_17, %c0_18] : memref<2x18x64xbf16, #tpu.memory_space<vmem>>, vector<1x16x64xbf16>
    %18 = vector.shape_cast %17 : vector<1x16x64xbf16> to vector<16x64xbf16>
    %c16_19 = arith.constant 16 : index
    %c64_20 = arith.constant 64 : index
    %19 = vector.load %arg7[%c16_19, %c64_20] : memref<32x192xbf16, #tpu.memory_space<vmem>>, vector<16x64xbf16>
    tpu.vector_store %arg7[%c16_19, %c64_20], %18 {strides = array<i32>} : memref<32x192xbf16, #tpu.memory_space<vmem>>, vector<16x64xbf16>,
    %c1_21 = arith.constant 1 : index
    %c2_22 = arith.constant 2 : index
    %c0_23 = arith.constant 0 : index
    %20 = vector.load %arg2[%c1_21, %c2_22, %c0_23] : memref<2x18x64xbf16, #tpu.memory_space<vmem>>, vector<1x16x64xbf16>
    %21 = vector.shape_cast %20 : vector<1x16x64xbf16> to vector<16x64xbf16>
    %c16_24 = arith.constant 16 : index
    %c128_25 = arith.constant 128 : index
    %22 = vector.load %arg7[%c16_24, %c128_25] : memref<32x192xbf16, #tpu.memory_space<vmem>>, vector<16x64xbf16>
    tpu.vector_store %arg7[%c16_24, %c128_25], %21 {strides = array<i32>} : memref<32x192xbf16, #tpu.memory_space<vmem>>, vector<16x64xbf16>,
    %c0_26 = arith.constant 0 : index
    %c0_27 = arith.constant 0 : index
    %23 = vector.load %arg7[%c0_26, %c0_27] : memref<32x192xbf16, #tpu.memory_space<vmem>>, vector<32x192xbf16>
    %c0_28 = arith.constant 0 : index
    %c0_29 = arith.constant 0 : index
    %24 = vector.load %arg3[%c0_28, %c0_29] : memref<192x128xbf16, #tpu.memory_space<vmem>>, vector<192x128xbf16>
    %cst = arith.constant dense<0.000000e+00> : vector<32x128xf32>
    %25 = tpu.matmul %23, %24, %cst {dimension_numbers = #tpu.dot_dimension_numbers<[1], [0], [0], [1], [0, 0, 1, 1], [], []>} : vector<32x192xbf16>, vector<192x128xbf16>, vector<32x128xf32> -> vector<32x128xf32>
    %c0_i32_30 = arith.constant 0 : i32
    %26 = arith.cmpi eq, %arg0, %c0_i32_30 : i32
    %27 = arith.extui %26 : i1 to i32
    %c0_i32_31 = arith.constant 0 : i32
    %28 = arith.cmpi ne, %27, %c0_i32_31 : i32
    scf.if %28 {
      %37 = tpu.iota {dimensions = array<i32: 0>} : vector<32x1xi32>
      %c16_i32 = arith.constant 16 : i32
      %c0_i32_36 = arith.constant 0 : i32
      %38 = arith.cmpi eq, %c16_i32, %c0_i32_36 : i32
      %c1_i32_37 = arith.constant 1 : i32
      %39 = arith.select %38, %c1_i32_37, %c16_i32 : i32
      %40 = vector.broadcast %39 : i32 to vector<32x1xi32>
      %41 = arith.remsi %37, %40 : vector<32x1xi32>
      %c0_i32_38 = arith.constant 0 : i32
      %42 = vector.broadcast %c0_i32_38 : i32 to vector<32x1xi32>
      %43 = arith.cmpi ne, %41, %42 : vector<32x1xi32>
      %c0_i32_39 = arith.constant 0 : i32
      %44 = vector.broadcast %c0_i32_39 : i32 to vector<32x1xi32>
      %45 = arith.cmpi slt, %41, %44 : vector<32x1xi32>
      %c0_i32_40 = arith.constant 0 : i32
      %46 = arith.cmpi slt, %39, %c0_i32_40 : i32
      %47 = vector.broadcast %46 : i1 to vector<32x1xi1>
      %48 = vector.broadcast %47 : vector<32x1xi1> to vector<32x1xi1>
      %49 = arith.xori %45, %48 : vector<32x1xi1>
      %50 = arith.andi %49, %43 : vector<32x1xi1>
      %51 = vector.broadcast %39 : i32 to vector<32x1xi32>
      %52 = arith.addi %41, %51 : vector<32x1xi32>
      %53 = arith.select %50, %52, %41 : vector<32x1xi1>, vector<32x1xi32>
      %c14_i32 = arith.constant 14 : i32
      %54 = vector.broadcast %c14_i32 : i32 to vector<32x1xi32>
      %55 = arith.cmpi slt, %53, %54 : vector<32x1xi32>
      %cst_41 = arith.constant 0.000000e+00 : f32
      %56 = vector.shape_cast %55 : vector<32x1xi1> to vector<32x1xi1>
      %57 = vector.broadcast %56 : vector<32x1xi1> to vector<32x128xi1>
      %58 = vector.broadcast %cst_41 : f32 to vector<32x128xf32>
      %59 = arith.select %57, %25, %58 : vector<32x128xi1>, vector<32x128xf32>
      %c0_42 = arith.constant 0 : index
      %c0_43 = arith.constant 0 : index
      %60 = vector.load %arg8[%c0_42, %c0_43] : memref<1x128xf32, #tpu.memory_space<vmem>>, vector<1x128xf32>
      %cst_44 = arith.constant dense<0.000000e+00> : vector<128xf32>
      %61 = vector.multi_reduction <add>, %59, %cst_44 [0] : vector<32x128xf32> to vector<128xf32>
      %62 = vector.shape_cast %61 : vector<128xf32> to vector<1x128xf32>
      %63 = arith.addf %60, %62 : vector<1x128xf32>
      %c0_45 = arith.constant 0 : index
      %c0_46 = arith.constant 0 : index
      %64 = vector.load %arg8[%c0_45, %c0_46] : memref<1x128xf32, #tpu.memory_space<vmem>>, vector<1x128xf32>
      tpu.vector_store %arg8[%c0_45, %c0_46], %63 {strides = array<i32>} : memref<1x128xf32, #tpu.memory_space<vmem>>, vector<1x128xf32>,
      %c0_47 = arith.constant 0 : index
      %c0_48 = arith.constant 0 : index
      %65 = vector.load %arg9[%c0_47, %c0_48] : memref<1x128xf32, #tpu.memory_space<vmem>>, vector<1x128xf32>
      %66 = arith.mulf %59, %25 : vector<32x128xf32>
      %cst_49 = arith.constant dense<0.000000e+00> : vector<128xf32>
      %67 = vector.multi_reduction <add>, %66, %cst_49 [0] : vector<32x128xf32> to vector<128xf32>
      %68 = vector.shape_cast %67 : vector<128xf32> to vector<1x128xf32>
      %69 = arith.addf %65, %68 : vector<1x128xf32>
      %c0_50 = arith.constant 0 : index
      %c0_51 = arith.constant 0 : index
      %70 = vector.load %arg9[%c0_50, %c0_51] : memref<1x128xf32, #tpu.memory_space<vmem>>, vector<1x128xf32>
      tpu.vector_store %arg9[%c0_50, %c0_51], %69 {strides = array<i32>} : memref<1x128xf32, #tpu.memory_space<vmem>>, vector<1x128xf32>,
    } else {
    }
    %c1_i32 = arith.constant 1 : i32
    %29 = arith.cmpi eq, %arg0, %c1_i32 : i32
    %c0_i32_32 = arith.constant 0 : i32
    %30 = arith.cmpi eq, %arg1, %c0_i32_32 : i32
    %31 = arith.andi %29, %30 : i1
    %32 = arith.extui %31 : i1 to i32
    %c0_i32_33 = arith.constant 0 : i32
    %33 = arith.cmpi ne, %32, %c0_i32_33 : i32
    scf.if %33 {
      %c0_36 = arith.constant 0 : index
      %c0_37 = arith.constant 0 : index
      %37 = vector.load %arg8[%c0_36, %c0_37] : memref<1x128xf32, #tpu.memory_space<vmem>>, vector<1x128xf32>
      %cst_38 = arith.constant 0.0357142873 : f32
      %38 = vector.broadcast %cst_38 : f32 to vector<1x128xf32>
      %39 = arith.mulf %37, %38 : vector<1x128xf32>
      %c0_39 = arith.constant 0 : index
      %c0_40 = arith.constant 0 : index
      %40 = vector.load %arg9[%c0_39, %c0_40] : memref<1x128xf32, #tpu.memory_space<vmem>>, vector<1x128xf32>
      %cst_41 = arith.constant 0.0357142873 : f32
      %41 = vector.broadcast %cst_41 : f32 to vector<1x128xf32>
      %42 = arith.mulf %40, %41 : vector<1x128xf32>
      %43 = arith.mulf %39, %39 : vector<1x128xf32>
      %44 = arith.subf %42, %43 : vector<1x128xf32>
      %cst_42 = arith.constant 0.000000e+00 : f32
      %45 = vector.broadcast %cst_42 : f32 to vector<1x128xf32>
      %46 = arith.maximumf %44, %45 : vector<1x128xf32>
      %c0_43 = arith.constant 0 : index
      %c0_44 = arith.constant 0 : index
      %47 = vector.load %arg4[%c0_43, %c0_44] : memref<1x128xf32, #tpu.memory_space<vmem>>, vector<1x128xf32>
      %cst_45 = arith.constant 9.99999974E-6 : f32
      %48 = vector.broadcast %cst_45 : f32 to vector<1x128xf32>
      %49 = arith.addf %46, %48 : vector<1x128xf32>
      %50 = math.rsqrt %49 : vector<1x128xf32>
      %51 = arith.mulf %47, %50 : vector<1x128xf32>
      %c0_46 = arith.constant 0 : index
      %c0_47 = arith.constant 0 : index
      %52 = vector.load %arg8[%c0_46, %c0_47] : memref<1x128xf32, #tpu.memory_space<vmem>>, vector<1x128xf32>
      tpu.vector_store %arg8[%c0_46, %c0_47], %51 {strides = array<i32>} : memref<1x128xf32, #tpu.memory_space<vmem>>, vector<1x128xf32>,
      %c0_48 = arith.constant 0 : index
      %c0_49 = arith.constant 0 : index
      %53 = vector.load %arg5[%c0_48, %c0_49] : memref<1x128xf32, #tpu.memory_space<vmem>>, vector<1x128xf32>
      %54 = arith.mulf %39, %51 : vector<1x128xf32>
      %55 = arith.subf %53, %54 : vector<1x128xf32>
      %c0_50 = arith.constant 0 : index
      %c0_51 = arith.constant 0 : index
      %56 = vector.load %arg9[%c0_50, %c0_51] : memref<1x128xf32, #tpu.memory_space<vmem>>, vector<1x128xf32>
      tpu.vector_store %arg9[%c0_50, %c0_51], %55 {strides = array<i32>} : memref<1x128xf32, #tpu.memory_space<vmem>>, vector<1x128xf32>,
    } else {
    }
    %c1_i32_34 = arith.constant 1 : i32
    %34 = arith.cmpi eq, %arg0, %c1_i32_34 : i32
    %35 = arith.extui %34 : i1 to i32
    %c0_i32_35 = arith.constant 0 : i32
    %36 = arith.cmpi ne, %35, %c0_i32_35 : i32
    scf.if %36 {
      %c0_36 = arith.constant 0 : index
      %c0_37 = arith.constant 0 : index
      %37 = vector.load %arg8[%c0_36, %c0_37] : memref<1x128xf32, #tpu.memory_space<vmem>>, vector<1x128xf32>
      %38 = vector.broadcast %37 : vector<1x128xf32> to vector<32x128xf32>
      %39 = arith.mulf %25, %38 : vector<32x128xf32>
      %c0_38 = arith.constant 0 : index
      %c0_39 = arith.constant 0 : index
      %40 = vector.load %arg9[%c0_38, %c0_39] : memref<1x128xf32, #tpu.memory_space<vmem>>, vector<1x128xf32>
      %41 = vector.broadcast %40 : vector<1x128xf32> to vector<32x128xf32>
      %42 = arith.addf %39, %41 : vector<32x128xf32>
      %cst_40 = arith.constant 0.000000e+00 : f32
      %43 = vector.broadcast %cst_40 : f32 to vector<32x128xf32>
      %44 = arith.maximumf %42, %43 : vector<32x128xf32>
      %45 = arith.truncf %44 : vector<32x128xf32> to vector<32x128xbf16>
      %c0_41 = arith.constant 0 : index
      %c0_42 = arith.constant 0 : index
      %46 = vector.load %arg6[%c0_41, %c0_42] : memref<32x128xbf16, #tpu.memory_space<vmem>>, vector<32x128xbf16>
      tpu.vector_store %arg6[%c0_41, %c0_42], %45 {strides = array<i32>} : memref<32x128xbf16, #tpu.memory_space<vmem>>, vector<32x128xbf16>,
    } else {
    }
    return
  }
  func.func @transform_0(%arg0: i32, %arg1: i32) -> (i32, i32, i32) {
    %c0_i32 = arith.constant 0 : i32
    %c0_i32_0 = arith.constant 0 : i32
    %c0_i32_1 = arith.constant 0 : i32
    return %arg1, %c0_i32, %c0_i32_0 : i32, i32, i32
  }
  func.func @transform_1(%arg0: i32, %arg1: i32) -> (i32, i32) {
    %c0_i32 = arith.constant 0 : i32
    %c0_i32_0 = arith.constant 0 : i32
    %c0_i32_1 = arith.constant 0 : i32
    return %c0_i32, %c0_i32_0 : i32, i32
  }
  func.func @transform_2(%arg0: i32, %arg1: i32) -> (i32, i32) {
    %c0_i32 = arith.constant 0 : i32
    %c0_i32_0 = arith.constant 0 : i32
    %c0_i32_1 = arith.constant 0 : i32
    return %c0_i32, %c0_i32_0 : i32, i32
  }
  func.func @transform_3(%arg0: i32, %arg1: i32) -> (i32, i32) {
    %c0_i32 = arith.constant 0 : i32
    %c0_i32_0 = arith.constant 0 : i32
    %c0_i32_1 = arith.constant 0 : i32
    return %c0_i32, %c0_i32_0 : i32, i32
  }
  func.func @transform_4(%arg0: i32, %arg1: i32) -> (i32, i32) {
    %0 = arith.muli %arg0, %arg1 : i32
    %c0_i32 = arith.constant 0 : i32
    %c0_i32_0 = arith.constant 0 : i32
    return %0, %c0_i32 : i32, i32
  }
}

</mosaic_0001>

<bundles_post_ra>
// kernel: tpu_custom_call.1
= control target key start
LH: loop header
LB: loop body
LE: loop exit
PB: predicated region body
PF: predicated region fallthrough
CT: control target
= control target key end

     0   :  { %9 = vsyncpa [#allocation6], 0  ;;  %s1298_s0 = inlined_call_operand.vmem [shape: bf16[2,18,64], index: 0, kind: input, shape index: {}]   ;;  %s1299_s1 = inlined_call_operand.hbm [shape: bf16[192,128], index: 1, kind: input, shape index: {}]   ;;  %s1300_s2 = inlined_call_operand.vmem [shape: f32[1,128], index: 2, kind: input, shape index: {}]   ;;  %s1301_s3 = inlined_call_operand.vmem [shape: f32[1,128], index: 3, kind: input, shape index: {}]   ;;  %s1302_s4 = inlined_call_operand.hbm [shape: bf16[32,128], index: 4, kind: output, shape index: {}]  }
   0x1   :  { %10 = vsyncpa [#allocation7], 0 }
   0x2   :  { %12 = vsyncpa [#allocation7 + $0x1], 0  ;;  %s1084_s15 = smov 0   ;;  %s1086_s16 = smov 0  }
   0x3   :  { %s1088_s17 = smov 0  }
   0x4 LB: > { %s806_s18 = sadd.s32 4294967295, %s1049_s17   ;;  %s807_s19 = sadd.s32 4294967294, %s1049_s17   ;;  %s1049_s17 = sphi %s1088_s17, %s18_s17   ;;  %s1045_s16 = sphi %s1086_s16, %s1311_s16   ;;  %s1041_s15 = sphi %s1084_s15, %s1310_s15  }
   0x5   : > { %s30_s20 = sadd.s32 1, %s1045_s16  ;;  %p808_p0 = scmp.ge.s32.totalorder %s1049_s17, 1 }
   0x6   : > { %p32_p1 = scmp.ge.s32.totalorder %s30_s20, 2  ;;  %p152_p2 = scmp.lt.s32.totalorder %s1049_s17, 3 }
   0x7   : > { %p1106_p3 = scmp.eq.s32.totalorder %s806_s18, 0  ;;  %s1051_s23 = smov [#allocation5]  }
   0x8   : > { %s1313_s20 = smov (%p32_p1, %s30_s20), 0  ;;  %p1112_p4 = pnand %p808_p0, %p152_p2 }
   0x9   : > { %s174_s24 = sshll.u32 %s1051_s23, 4  ;;  %s175_s24 = int_to_ptr.vmem [resolvable:$true] %s174_s24 }
   0xa   : > { %p904_p5 = pneg %p1112_p4  ;;  %s980_s25 = scalar_lea.vmem %s175_s24, 1536 }
   0xb   : > { %p981_p8 = scmp.ne.s32.totalorder %s175_s24, %s980_s25  ;;  %p988_p11 = scmp.lt.s32.totalorder %s175_s24, %s175_s24 }
   0xc   : > { %p905_p6 = pnand %p1106_p3, %p904_p5  ;;  %p989_p12 = scmp.lt.s32.totalorder %s980_s25, %s980_s25 }
   0xe   : > { %p971_p7 = pneg %p905_p6  ;;  %p990_p13 = por %p989_p12, %p988_p11 }
  0x10   : > { %p983_p9 = pnand %p981_p8, %p971_p7 }
  0x12   : > { %p984_p10 = pneg %p983_p9 }
  0x14   : > { %p991_p0 = pnand %p990_p13, %p984_p10 }
  0x16   : > { %994 = shalt.err (!%p991_p0)
}
  0x17   : > { %s1052_s26 = smov 64   ;;  %s1053_s27 = smov 4  }
  0x18   : > { %907 = dma.hbm_to_vmem [thread:$0]  (!%p905_p6), %s1299_s1, 1536, %s175_s24, [#allocation6], %s1052_s26, %s1052_s26, %s1053_s27  }
  0x19   : > { %196 = sbr.rel (%p1112_p4) target bundleno = 476 (0x1dc), region = 36 }
  0x1e   : > { %1032 = dma.done.wait (%p1106_p3), [#allocation6], 1536  }
  0x1f   : > { %1034 = vsyncadd (%p1106_p3), [#allocation6], 4294965760  ;;  %p233_p1 = scmp.eq.s32.totalorder %s1041_s15, 0 }
  0x20   : > { %v1054_v0 = vmov (%p233_p1), 0.0  }
  0x21   : > { %238 = sbr.rel (!%p233_p1) target bundleno = 38 (0x26), region = 44  ;;  %239 = vst [vmem:[#allocation3] sm:$0x1] (%p233_p1), %v1054_v0  ;;  %240 = vst [vmem:[#allocation4] sm:$0x1] (%p233_p1), %v1054_v0 }
  0x26 PF: > { %vm249_vm0 = vsmask.f32 3328  ;;  %vm250_vm1 = vsmask.f32 7440  ;;  %v817_v1 = vld [vmem:[%s1298_s0 + $0xc] sm:$0xf] }
  0x27   : > { %v818_v2 = vld [vmem:[%s1298_s0 + $0x10] sm:$0xf]  ;;  %v1055_v3 = vmov 0   ;;  %v314_v4 = vshrl.u32 %v817_v1, 16  ;;  %v317_v5 = vshll.u32 %v817_v1, 16  ;;  %v949_v26 = vld [vmem:[#allocation5 + $0x38] sm:$0xff]   ;;  %vm1152_vm2 = vmor %vm249_vm0, %vm250_vm1 }
  0x28   : > { %487 = vmatprep.subr.bf16.mxu0 %v1055_v3  ;;  %872 = vmatprep.subr.bf16.mxu1 %v1055_v3  ;;  %v323_v6 = vshll.u32 %v818_v2, 16  ;;  %v327_v7 = vshrl.u32 %v818_v2, 16  ;;  %v246_v8 = vld [vmem:[%s1298_s0] sm:$0xf]  ;;  %v247_v9 = vld [vmem:[%s1298_s0 + $0x4] sm:$0xf] }
  0x29   : > { %v253_v10 = vshrl.u32 %v246_v8, 16  ;;  %v256_v11 = vshll.u32 %v246_v8, 16  ;;  %v819_v12 = vld [vmem:[%s1298_s0 + $0x14] sm:$0x1]  ;;  %v316_v13 = vrot.slane %v314_v4, 4  ;;  %v319_v14 = vrot.slane %v317_v5, 5  ;;  %488 = vmatpush1.bf16.msra.mxu0 %v949_v26  ;;  %884 = vmatpush1.bf16.msra.mxu1 %v949_v26 }
  0x2a   : > { %v325_v15 = vrot.slane %v323_v6, 5  ;;  %v329_v16 = vrot.slane %v327_v7, 4  ;;  %v248_v17 = vld [vmem:[%s1298_s0 + $0x8] sm:$0x1]  ;;  %v262_v20 = vshll.u32 %v247_v9, 16  ;;  %v266_v21 = vshrl.u32 %v247_v9, 16  ;;  %489 = vmatprep.subr.bf16.mxu0 %v1055_v3  ;;  %873 = vmatprep.subr.bf16.mxu1 %v1055_v3 }
  0x2b   : > { %v255_v18 = vrot.slane %v253_v10, 4  ;;  %v258_v19 = vrot.slane %v256_v11, 5  ;;  %v320_v22 = vor.u32 %v319_v14, %v316_v13  ;;  %v333_v24 = vshll.u32 %v819_v12, 16  ;;  %v950_v34 = vld [vmem:[#allocation5 + $0x30] sm:$0xff]   ;;  %s1056_s22 = smov 64   ;;  %v951_v42 = vld [vmem:[#allocation5 + $0x28] sm:$0xff]  }
  0x2c   : > { %v330_v23 = vor.u32 %v329_v16, %v325_v15  ;;  %v272_v25 = vshll.u32 %v248_v17, 16  ;;  %v264_v29 = vrot.slane %v262_v20, 5  ;;  %v268_v30 = vrot.slane %v266_v21, 4  ;;  %v815_v44 = vld [vmem:[%s1298_s0 + $0xc] sm:$0xf]  ;;  %v952_v46 = vld [vmem:[#allocation5 + $0x20] sm:$0xff]  }
  0x2d   : > { %v259_v28 = vor.u32 %v258_v19, %v255_v18  ;;  %v321_v31 = vrot.slane %v320_v22, 4  ;;  %v335_v33 = vrot.slane %v333_v24, 5  ;;  %490 = vmatpush1.bf16.msra.mxu0 %v950_v34  ;;  %vm243_vm3 = vcmask 519168   ;;  %885 = vmatpush1.bf16.msra.mxu1 %v950_v34  ;;  %v241_v45 = vld [vmem:[%s1298_s0] sm:$0xf]  ;;  %v954_v1 = vld [vmem:[#allocation5 + $0x10] sm:$0xff]  }
  0x2e   : > { %v331_v32 = vrot.slane %v330_v23, 4  ;;  %v269_v36 = vor.u32 %v268_v30, %v264_v29  ;;  %v274_v37 = vrot.slane %v272_v25, 5  ;;  %491 = vmatprep.subr.bf16.mxu0 %v1055_v3  ;;  %874 = vmatprep.subr.bf16.mxu1 %v1055_v3  ;;  %308 = vst.msk [vmem:[#allocation2 + $0x10] sm:$0xf] %vm243_vm3, %v815_v44  ;;  %244 = vst.msk [vmem:[#allocation2] sm:$0xf] %vm243_vm3, %v241_v45 }
  0x2f   : > { %v260_v35 = vrot.slane %v259_v28, 4  ;;  %v326_v38 = vsel %vm1152_vm2, %v321_v31, %v325_v15  ;;  %v816_v47 = vld [vmem:[%s1298_s0 + $0x10] sm:$0xf]  ;;  %v242_v48 = vld [vmem:[%s1298_s0 + $0x4] sm:$0xf]  ;;  %vm291_vm4 = vcmask 1042432  }
  0x30   : > { %337 = vrot.lane.b32.xlu1 %v326_v38, %s1056_s22  ;;  %v270_v40 = vrot.slane %v269_v36, 4  ;;  %v336_v41 = vsel %vm1152_vm2, %v331_v32, %v335_v33  ;;  %309 = vst.msk [vmem:[#allocation2 + $0x18] sm:$0xf] %vm243_vm3, %v816_v47  ;;  %245 = vst.msk [vmem:[#allocation2 + $0x8] sm:$0xf] %vm243_vm3, %v242_v48  ;;  %vm292_vm5 = vcmask 1046532  }
  0x31   : > { %v265_v39 = vsel %vm1152_vm2, %v260_v35, %v264_v29  ;;  %492 = vmatpush1.bf16.msra.mxu0 %v951_v42  ;;  %886 = vmatpush1.bf16.msra.mxu1 %v951_v42  ;;  %v953_v49 = vld [vmem:[#allocation5 + $0x18] sm:$0xff]   ;;  %v286_v51 = vld [vmem:[%s1298_s0 + $0x4] sm:$0xf]  ;;  %v287_v52 = vld [vmem:[%s1298_s0 + $0x8] sm:$0x1]  ;;  %vm282_vm7 = vcmask 1043968  }
  0x32   : > { %276 = vrot.lane.b32.xlu0 %v265_v39, %s1056_s22  ;;  %v275_v43 = vsel %vm1152_vm2, %v270_v40, %v274_v37  ;;  %493 = vmatprep.subr.bf16.mxu0 %v1055_v3  ;;  %v285_v50 = vld [vmem:[%s1298_s0] sm:$0xe]  ;;  %vm1200_vm6 = vmor %vm291_vm4, %vm292_vm5  ;;  %v296_v55 = vrot.slane %v286_v51, 5  ;;  %v299_v56 = vrot.slane %v287_v52, 5  ;;  %v820_v57 = vld [vmem:[%s1298_s0 + $0xc] sm:$0xe] }
  0x33   : > { %875 = vmatprep.subr.bf16.mxu1 %v1055_v3  ;;  %v814_v54 = vrot.slane %v285_v50, 9  ;;  %v821_v58 = vld [vmem:[%s1298_s0 + $0x10] sm:$0xf]  ;;  %v822_v59 = vld [vmem:[%s1298_s0 + $0x14] sm:$0x1]  ;;  %v823_v60 = vrot.slane %v820_v57, 9 }
  0x34   : > { %339 = vrot.lane.b32.xlu1 %v336_v41, %s1056_s22  ;;  %v298_v62 = vrot.slane %v296_v55, 4  ;;  %v353_v63 = vrot.slane %v821_v58, 5  ;;  %v356_v0 = vrot.slane %v822_v59, 5  ;;  %v955_v7 = vld [vmem:[#allocation5 + $0x8] sm:$0xff]   ;;  %v956_v8 = vld [vmem:[#allocation5] sm:$0xff]   ;;  %v957_v9 = vld [vmem:[#allocation5 + $0x58] sm:$0xff]  }
  0x35   : > { %494 = vmatpush1.bf16.msra.mxu0 %v952_v46  ;;  %887 = vmatpush1.bf16.msra.mxu1 %v952_v46  ;;  %v297_v61 = vsel %vm1200_vm6, %v814_v54, %v296_v55  ;;  %v958_v10 = vld [vmem:[#allocation5 + $0x50] sm:$0xff]   ;;  %v959_v11 = vld [vmem:[#allocation5 + $0x48] sm:$0xff]   ;;  %v960_v12 = vld [vmem:[#allocation5 + $0x40] sm:$0xff]   ;;  %vm480_vm8 = vcmask 523264   ;;  %p842_p2 = scmp.ne.s32.totalorder %s1041_s15, 0 }
  0x36   : > { %278 = vrot.lane.b32.xlu0 %v275_v43, %s1056_s22  ;;  %495 = vmatprep.subr.bf16.mxu0 %v1055_v3  ;;  %303 = vst.msk [vmem:[#allocation2 + $0x4] sm:$0xf] %vm243_vm3, %v297_v61  ;;  %v300_v2 = vsel %vm1200_vm6, %v298_v62, %v299_v56  ;;  %v354_v4 = vsel %vm1200_vm6, %v823_v60, %v353_v63  ;;  %v355_v5 = vrot.slane %v353_v63, 4 }
  0x37   : > { %876 = vmatprep.subr.bf16.mxu1 %v1055_v3  ;;  %304 = vst.msk [vmem:[#allocation2 + $0xc] sm:$0xf] %vm243_vm3, %v300_v2  ;;  %360 = vst.msk [vmem:[#allocation2 + $0x14] sm:$0xf] %vm243_vm3, %v354_v4 }
  0x38   : > { %v357_v6 = vsel %vm1200_vm6, %v355_v5, %v356_v0 }
  0x39   : > { %496 = vmatpush1.bf16.msra.mxu0 %v953_v49  ;;  %888 = vmatpush1.bf16.msra.mxu1 %v953_v49  ;;  %361 = vst.msk [vmem:[#allocation2 + $0x1c] sm:$0xf] %vm243_vm3, %v357_v6 }
  0x3a   : > { %497 = vmatprep.subr.bf16.mxu0 %v1055_v3  ;;  %877 = vmatprep.subr.bf16.mxu1 %v1055_v3 }
  0x3d   : > { %498 = vmatpush1.bf16.msra.mxu0 %v954_v1  ;;  %889 = vmatpush1.bf16.msra.mxu1 %v954_v1 }
  0x3e   : > { %499 = vmatprep.subr.bf16.mxu0 %v1055_v3  ;;  %878 = vmatprep.subr.bf16.mxu1 %v1055_v3  ;;  %v963_v20 = vld [vmem:[#allocation2 + $0x4] ss:$8 sps:$4 sm:$0xff]  }
  0x3f   : > { %840 = vmatprep.mubr.msk.bf16.mxu0 %vm480_vm8, %v963_v20 }
  0x40   : > { %v966_v18 = vld [vmem:[#allocation2 + $0x14] ss:$8 sps:$4 sm:$0xff]  }
  0x41   : > { %500 = vmatpush1.bf16.msra.mxu0 %v955_v7  ;;  %890 = vmatpush1.bf16.msra.mxu1 %v955_v7 }
  0x42   : > { %501 = vmatprep.subr.bf16.mxu0 %v1055_v3  ;;  %879 = vmatprep.subr.bf16.mxu1 %v1055_v3 }
  0x43   : > { %841 = vmatprep.mubr.msk.bf16.mxu1 %vm480_vm8, %v966_v18 }
  0x45   : > { %502 = vmatpush1.bf16.msra.mxu0 %v956_v8  ;;  %891 = vmatpush1.bf16.msra.mxu1 %v956_v8 }
  0x46   : > { %511 = vmatprep.subr.bf16.mxu0 %v1055_v3  ;;  %880 = vmatprep.subr.bf16.mxu1 %v1055_v3 }
  0x49   : > { %512 = vmatpush2.bf16.msra.mxu0 %v957_v9  ;;  %892 = vmatpush2.bf16.msra.mxu1 %v957_v9 }
  0x4a   : > { %513 = vmatprep.subr.bf16.mxu0 %v1055_v3  ;;  %881 = vmatprep.subr.bf16.mxu1 %v1055_v3 }
  0x4d   : > { %514 = vmatpush2.bf16.msra.mxu0 %v958_v10  ;;  %893 = vmatpush2.bf16.msra.mxu1 %v958_v10 }
  0x4e   : > { %515 = vmatprep.subr.bf16.mxu0 %v1055_v3  ;;  %882 = vmatprep.subr.bf16.mxu1 %v1055_v3 }
  0x51   : > { %516 = vmatpush2.bf16.msra.mxu0 %v959_v11  ;;  %894 = vmatpush2.bf16.msra.mxu1 %v959_v11 }
  0x52   : > { %517 = vmatprep.subr.bf16.mxu0 %v1055_v3  ;;  %883 = vmatprep.subr.bf16.mxu1 %v1055_v3 }
  0x55   : > { %518 = vmatpush2.bf16.msra.mxu0 %v960_v12  ;;  %895 = vmatpush2.bf16.msra.mxu1 %v960_v12 }
  0xa2   : > { %v338_v13 = vpop.permute.xlu1 %337 }
  0xa3   : > { %343 = vst.msk [vmem:[#allocation2 + $0x10] sm:$0xf] %vm282_vm7, %v338_v13 }
  0xa4   : > { %v277_v14 = vpop.permute.xlu0 %276 }
  0xa5   : > { %283 = vst.msk [vmem:[#allocation2] sm:$0xf] %vm282_vm7, %v277_v14 }
  0xa6   : > { %v340_v15 = vpop.permute.xlu1 %339 }
  0xa7   : > { %344 = vst.msk [vmem:[#allocation2 + $0x18] sm:$0xf] %vm282_vm7, %v340_v15 }
  0xa8   : > { %v279_v16 = vpop.permute.xlu0 %278 }
  0xa9   : > { %284 = vst.msk [vmem:[#allocation2 + $0x8] sm:$0xf] %vm282_vm7, %v279_v16 }
  0xae   : > { %v964_v17 = vld [vmem:[#allocation2 + $0x10] ss:$8 sps:$4 sm:$0xff]  }
  0xaf   : > { %528 = vmatmul.mubr.bf16.vlgmr.msra.gmra.mxu1 %v964_v17 }
  0xb0   : > { %v961_v19 = vld [vmem:[#allocation2] ss:$8 sps:$4 sm:$0xff]  }
  0xb1   : > { %520 = vmatmul.mubr.bf16.vlgmr.msra.gmra.mxu0 %v961_v19 }
 0x16f   : > { %v1240_v3 = vpop.f32.mrf.mxu1 }
 0x171   : > { %v1242_v21 = vpop.f32.mrf.mxu0  ;;  %v531_v22 = vpop.f32.mrf.mxu1 }
 0x173   : > { %v523_v23 = vpop.f32.mrf.mxu0  ;;  %v1244_v24 = vpop.f32.mrf.mxu1  ;;  %538 = sbr.rel (%p842_p2) target bundleno = 409 (0x199), region = 48 }
 0x175   : > { %v1246_v25 = vpop.f32.mrf.mxu0  ;;  %v534_v26 = vpop.f32.mrf.mxu1 }
 0x177   : > { %v526_v27 = vpop.f32.mrf.mxu0 }
 0x178   : > { %v539_v28 = vlaneseq  ;;  %v621_v34 = vmul.f32 %v1242_v21, %v1242_v21  ;;  %v623_v39 = vmul.f32 %v1240_v3, %v1240_v3  ;;  %v608_v55 = vld [vmem:[#allocation3] sm:$0x1]  ;;  %v620_v58 = vld [vmem:[#allocation4] sm:$0x1] }
 0x17a   : > { %v540_v29 = vshrl.u32 %v539_v28, 7 }
 0x17c   : > { %v541_v30 = vadd.s32 8, %v540_v29  ;;  %v543_v31 = vadd.s32 24, %v540_v29 }
 0x17e   : > { %v555_v32 = vand.u32 15, %v541_v30  ;;  %v569_v33 = vand.u32 15, %v543_v31 }
 0x180   : > { %vm593_vm9 = vcmp.lt.s32.totalorder %v555_v32, 14  ;;  %vm595_vm10 = vcmp.lt.s32.totalorder %v569_v33, 14 }
 0x181   : > { %v605_v35 = vsel %vm593_vm9, %v1246_v25, 0.0  ;;  %v607_v36 = vsel %vm595_vm10, %v1244_v24, 0.0 }
 0x182   : > { %v609_v37 = vadd.f32 %v605_v35, %v1242_v21  ;;  %v622_v38 = vmul.f32 %v605_v35, %v1246_v25  ;;  %v624_v41 = vmul.f32 %v607_v36, %v1244_v24 }
 0x184   : > { %v610_v40 = vadd.f32 %v609_v37, %v1240_v3  ;;  %v625_v42 = vadd.f32 %v622_v38, %v621_v34 }
 0x186   : > { %v611_v43 = vadd.f32 %v610_v40, %v607_v36  ;;  %v626_v44 = vadd.f32 %v625_v42, %v623_v39 }
 0x188   : > { %v612_v45 = vrot.slane %v611_v43, 4  ;;  %v627_v46 = vadd.f32 %v626_v44, %v624_v41 }
 0x18a   : > { %v613_v47 = vadd.f32 %v612_v45, %v611_v43  ;;  %v628_v48 = vrot.slane %v627_v46, 4 }
 0x18c   : > { %v614_v49 = vrot.slane %v613_v47, 2  ;;  %v629_v50 = vadd.f32 %v628_v48, %v627_v46 }
 0x18e   : > { %v615_v51 = vadd.f32 %v614_v49, %v613_v47  ;;  %v630_v52 = vrot.slane %v629_v50, 2 }
 0x190   : > { %v616_v53 = vrot.slane %v615_v51, 1  ;;  %v631_v54 = vadd.f32 %v630_v52, %v629_v50 }
 0x192   : > { %v617_v56 = vadd.f32 %v616_v53, %v615_v51  ;;  %v632_v57 = vrot.slane %v631_v54, 1 }
 0x194   : > { %v618_v59 = vadd.f32 %v617_v56, %v608_v55  ;;  %v633_v60 = vadd.f32 %v632_v57, %v631_v54 }
 0x196   : > { %619 = vst [vmem:[#allocation3] sm:$0x1] %v618_v59  ;;  %v634_v61 = vadd.f32 %v633_v60, %v620_v58 }
 0x198   : > { %635 = vst [vmem:[#allocation4] sm:$0x1] %v634_v61 }
 0x199 PF: > { %p636_p3 = scmp.eq.s32.totalorder %s1041_s15, 1 }
 0x19a   : > { %v648_v7 = vld [vmem:[%s1300_s2] sm:$0x1] (%p636_p3) }
 0x19b   : > { %640 = sbr.rel (!%p636_p3) target bundleno = 445 (0x1bd), region = 52  ;;  %v653_v10 = vld [vmem:[%s1301_s3] sm:$0x1] (%p636_p3) }
 0x19d   : > { %v641_v62 = vld [vmem:[#allocation3] sm:$0x1] (%p636_p3) }
 0x19e   : > { %v642_v0 = vmul.f32 (%p636_p3), 0.035714287, %v641_v62 }
 0x19f   : > { %v643_v63 = vld [vmem:[#allocation4] sm:$0x1] (%p636_p3) }
 0x1a0   : > { %v644_v1 = vmul.f32 0.035714287, %v643_v63  ;;  %v645_v2 = vmul.f32 %v642_v0, %v642_v0 }
 0x1a2   : > { %v646_v4 = vsub.f32 %v644_v1, %v645_v2 }
 0x1a4   : > { %v647_v5 = vmax.f32 %v646_v4, 0.0 }
 0x1a6   : > { %v649_v6 = vadd.f32 1e-05, %v647_v5 }
 0x1a8   : > { %967 = vrsqrt.f32 %v649_v6 }
 0x1b5   : > { %v968_v8 = vpop.eup %967 }
 0x1b6   : > { %v651_v9 = vmul.f32 %v968_v8, %v648_v7 }
 0x1b8   : > { %652 = vst [vmem:[#allocation3] sm:$0x1] %v651_v9  ;;  %v654_v11 = vmul.f32 %v651_v9, %v642_v0 }
 0x1ba   : > { %v655_v12 = vsub.f32 %v653_v10, %v654_v11 }
 0x1bc   : > { %656 = vst [vmem:[#allocation4] sm:$0x1] %v655_v12 }
 0x1bd PF: > { %p844_p4 = scmp.ne.s32.totalorder %s1041_s15, 1 }
 0x1bf   : > { %659 = sbr.rel (%p844_p4) target bundleno = 462 (0x1ce), region = 56 }
 0x1c4   : > { %v845_v13 = vld [vmem:[#allocation3] ss:$0 sm:$0xff]  ;;  %v846_v14 = vld [vmem:[#allocation4] ss:$0 sm:$0xff] }
 0x1c5   : > { %v667_v15 = vmul.f32 %v845_v13, %v1242_v21  ;;  %v668_v16 = vmul.f32 %v845_v13, %v1246_v25  ;;  %v669_v17 = vmul.f32 %v845_v13, %v1240_v3  ;;  %v670_v18 = vmul.f32 %v845_v13, %v1244_v24 }
 0x1c7   : > { %v678_v19 = vadd.f32 %v846_v14, %v667_v15  ;;  %v679_v20 = vadd.f32 %v846_v14, %v668_v16  ;;  %v680_v22 = vadd.f32 %v846_v14, %v669_v17  ;;  %v681_v23 = vadd.f32 %v846_v14, %v670_v18 }
 0x1c9   : > { %v682_v26 = vmax.f32 %v678_v19, 0.0  ;;  %v683_v27 = vmax.f32 %v679_v20, 0.0  ;;  %v684_v28 = vmax.f32 %v680_v22, 0.0  ;;  %v685_v29 = vmax.f32 %v681_v23, 0.0 }
 0x1cb   : > { %v864_v30 = vpack.c.bf16 %v683_v27, %v682_v26  ;;  %v869_v31 = vpack.c.bf16 %v685_v29, %v684_v28 }
 0x1cd   : > { %865 = vst [vmem:[#allocation8] sm:$0xff] %v864_v30   ;;  %871 = vst [vmem:[#allocation8 + $0x8] sm:$0xff] %v869_v31  }
 0x1ce PF: > { %p1273_p5 = scmp.eq.s32.totalorder %s806_s18, 1  ;;  %s1057_s28 = smov [#allocation8]  }
 0x1cf   : > { %s721_s29 = sshll.u32 %s1057_s28, 4  ;;  %s722_s29 = int_to_ptr.vmem [resolvable:$true] %s721_s29 }
 0x1d0   : > { %s995_s30 = scalar_lea.vmem %s722_s29, 256  ;;  %s1001_s5 = scalar_lea.vmem %s722_s29, 512 }
 0x1d1   : > { %p996_p6 = scmp.ne.s32.totalorder %s722_s29, %s995_s30  ;;  %p1002_p9 = scmp.lt.s32.totalorder %s722_s29, %s722_s29 }
 0x1d2   : > { %p1003_p10 = scmp.lt.s32.totalorder %s1001_s5, %s995_s30 }
 0x1d3   : > { %p997_p7 = pnand %p996_p6, %p1273_p5 }
 0x1d4   : > { %p1004_p11 = por %p1003_p10, %p1002_p9 }
 0x1d5   : > { %p998_p8 = pneg %p997_p7 }
 0x1d7   : > { %p1005_p12 = pnand %p1004_p11, %p998_p8 }
 0x1d9   : > { %1008 = shalt.err (!%p1005_p12)
}
 0x1da   : > { %s1058_s6 = smov 4  }
 0x1db   : > { %901 = dma.vmem_to_hbm [thread:$0]  (%p1273_p5), %s722_s29, 256, %s1302_s4, [#allocation7], %s1056_s22, %s1056_s22, %s1058_s6  }
 0x1dc PF: > { %p915_p13 = scmp.ge.s32.totalorder %s1049_s17, 2  ;;  %p916_p0 = scmp.eq.s32.totalorder %s807_s19, 1 }
 0x1de   : > { %p909_p1 = pnand %p916_p0, %p915_p13 }
 0x1e0   : > { %p910_p2 = pneg %p909_p1 }
 0x1e2   : > { %1036 = dma.done.wait (%p910_p2), [#allocation7], 256  }
 0x1e3   : > { %1038 = vsyncadd (%p910_p2), [#allocation7], 4294967040  ;;  %s18_s17 = sadd.s32 1, %s1049_s17   ;;  %s1310_s15 = smov %s1045_s16 }
 0x1e4   : > { %p15_p3 = scmp.ge.s32.totalorder %s18_s17, 4   ;;  %s1311_s16 = smov %s1313_s20 }
 0x1e6   :  { %17 = sbr.rel (!%p15_p3) target bundleno = 4 (0x4), region = 93 }
 0x1eb   :  { %742 = vsyncpa [#allocation6], 1 }
 0x1ec   :  { %744 = vsyncpa [#allocation6 + $0x1], 1 }
 0x1ed   :  { %745 = vsyncpa [#allocation7], 1 }
 0x1ee   :  { %747 = vsyncpa [#allocation7 + $0x1], 1 }

</bundles_post_ra>
